<compile_context>
chip_gen: v7x
topology: tpu7x:2x2x1
jax: 0.10.0
libtpu: 0.0.40
codegen_flags: <defaults>
</compile_context>

<pallas_src>
import functools

import jax
import jax.numpy as jnp
from jax import lax
from jax.experimental import pallas as pl
from jax.experimental.pallas import tpu as pltpu


def _rbf_attn_kernel(mask_k_ref, q_ref, k_ref, v_ref, o_ref, acc_ref, *,
                     compute_dtype):
    # Block shapes seen by the kernel:
    #   mask_k_ref: (G, 1, Tk)     q_ref: (G, Tq, p)
    #   k_ref/v_ref: (G, Tk, p)    o_ref: (G, Tq, p)
    #   acc_ref:    (G, Tq, p) f32 scratch (resident across the KV axis)
    ki = pl.program_id(2)

    @pl.when(ki == 0)
    def _():
        acc_ref[...] = jnp.zeros_like(acc_ref)

    q = q_ref[...]                       # already mask * p**-0.25 scaled (f32)
    k = k_ref[...]
    m_k = mask_k_ref[...]                # (G, 1, Tk) of 0/1 (f32)

    # 0.5*||q||^2 per query row; fused key-side bias: diag_K + 1e9*(1 - mask).
    diag_q = 0.5 * jnp.sum(q * q, axis=-1, keepdims=True)              # (G, Tq, 1)
    row_bias = (0.5 * jnp.sum(k * k, axis=-1))[:, None, :] \
        + 1e9 * (1.0 - m_k)                                            # (G, 1, Tk)

    # Q K^T on the MXU: bf16 operands (by default), f32 accumulation.
    qk = lax.dot_general(
        q.astype(compute_dtype), k.astype(compute_dtype),
        dimension_numbers=(((2,), (2,)), ((0,), (0,))),
        preferred_element_type=jnp.float32)                            # (G, Tq, Tk)

    s = qk - diag_q - row_bias          # <= ~0 -> exp never overflows
    attn = jnp.exp(s)                   # f32 exp on the EUP
    # TODO(synk): attention dropout (self.drop_attn) is identity in eval mode;
    # not implemented (would use pltpu.prng_seed / pltpu.stateful_bernoulli).

    acc_ref[...] += lax.dot_general(
        attn.astype(compute_dtype), v_ref[...].astype(compute_dtype),
        dimension_numbers=(((2,), (1,)), ((0,), (0,))),
        preferred_element_type=jnp.float32)                            # (G, Tq, p)

    @pl.when(ki == pl.num_programs(2) - 1)
    def _():
        o_ref[...] = acc_ref[...].astype(o_ref.dtype)


def _pick_tile(n, target, multiple):
    """Largest divisor of n that is <= target and a multiple of `multiple`;
    falls back to the full extent n (full-dim blocks are always legal)."""
    if n <= target:
        return n
    for d in range(min(target, n), 0, -1):
        if n % d == 0 and d % multiple == 0:
            return d
    return n


def softmax_attention_rbf(Q, K, V, mask, *, block_q=256, block_k=256,
                          head_group=None, compute_dtype=jnp.bfloat16):
    """Q, K, V: (b, h, n, p); mask: (b, n) of 0/1."""
    b, h, n, p = Q.shape
    bh = b * h
    scale = float(p) ** (-0.25)

    mask_f = mask.astype(jnp.float32)
    # Fold the (column) mask and the data normalizer directly into Q and K.
    # Keeps every kernel input lane-dense (no (n, 1) mask blocks) and matches
    # the reference math exactly because mask is 0/1.
    scale_qk = mask_f[:, None, :, None] * scale
    Qm = (Q.astype(jnp.float32) * scale_qk).reshape(bh, n, p)
    Km = (K.astype(jnp.float32) * scale_qk).reshape(bh, n, p)
    Vf = V.reshape(bh, n, p)
    mask_k = jnp.broadcast_to(mask_f[:, None, :], (b, h, n)).reshape(bh, 1, n)

    # Tile sizes. Tk must be a multiple of 128 (it is the last dim of the mask
    # block) or the full n; Tq only needs sublane (8) alignment or full n.
    tq = _pick_tile(n, block_q, 8)
    tk = _pick_tile(n, block_k, 128)
    if head_group is None:
        head_group = max(1, 512 // max(n, 1))   # batch heads when n is small
    g = _pick_tile(bh, head_group, 1)

    grid = (bh // g, n // tq, n // tk)

    # VMEM budget: double-buffered Q/K/V/O blocks + mask blocks + accumulator
    # + a handful of score-sized temporaries, with 2x headroom, capped below
    # v7x's 64 MiB physical VMEM.
    tile_bytes = 4 * (
        2 * (g * tq * p + 2 * g * tk * p + g * tq * p)
        + 2 * g * tk
        + g * tq * p
        + 6 * g * tq * tk
    )
    vmem_limit = int(min(48 * 2**20, max(8 * 2**20, 2 * tile_bytes)))

    kernel = functools.partial(_rbf_attn_kernel, compute_dtype=compute_dtype)

    out = pl.pallas_call(
        kernel,
        out_shape=jax.ShapeDtypeStruct((bh, n, p), Q.dtype),
        grid=grid,
        in_specs=[
            pl.BlockSpec((g, 1, tk), lambda gi, qi, ki: (gi, 0, ki)),   # key mask row
            pl.BlockSpec((g, tq, p), lambda gi, qi, ki: (gi, qi, 0)),   # Q (pre-masked)
            pl.BlockSpec((g, tk, p), lambda gi, qi, ki: (gi, ki, 0)),   # K (pre-masked)
            pl.BlockSpec((g, tk, p), lambda gi, qi, ki: (gi, ki, 0)),   # V
        ],
        out_specs=pl.BlockSpec((g, tq, p), lambda gi, qi, ki: (gi, qi, 0)),
        scratch_shapes=[pltpu.VMEM((g, tq, p), jnp.float32)],
        compiler_params=pltpu.CompilerParams(
            dimension_semantics=("parallel", "parallel", "arbitrary"),
            vmem_limit_bytes=vmem_limit),
    )(mask_k, Qm, Km, Vf)

    return out.reshape(b, h, n, p)


def _reference(Q, K, V, mask):
    p = Q.shape[-1]
    scale = float(p) ** (-0.25)
    m = mask[:, None, :, None].astype(jnp.float32)
    Qm = Q * (m * scale)
    Km = K * (m * scale)
    diag_Q = 0.5 * jnp.sum(Qm * Qm, axis=-1)[..., :, None]
    diag_K = 0.5 * jnp.sum(Km * Km, axis=-1)[..., None, :]
    product = (jnp.einsum('...np,...mp->...nm', Qm, Km)
               - diag_Q - diag_K
               - 1e9 * (1.0 - mask[:, None, None, :]))
    attn = jnp.exp(product)
    return jnp.matmul(attn, V)


if __name__ == "__main__":
    key = jax.random.PRNGKey(0)

    def make_inputs(k, b, h, n, p):
        kq, kk, kv, km = jax.random.split(k, 4)
        Q = jax.random.normal(kq, (b, h, n, p), dtype=jnp.float32)
        K = jax.random.normal(kk, (b, h, n, p), dtype=jnp.float32)
        V = jax.random.normal(kv, (b, h, n, p), dtype=jnp.float32)
        mask = jax.random.bernoulli(km, 0.8, (b, n)).astype(jnp.float32)
        return Q, K, V, mask

    k1, k2 = jax.random.split(key)

    # --- config 1: tiny shapes; all heads folded into a single grid step ---
    Q, K, V, mask = make_inputs(k1, 2, 2, 16, 32)
    ref = _reference(Q, K, V, mask)

    out_f32 = jax.block_until_ready(
        softmax_attention_rbf(Q, K, V, mask, compute_dtype=jnp.float32))
    assert out_f32.shape == Q.shape
    assert jnp.allclose(out_f32, ref, atol=5e-4, rtol=5e-4), "f32 path mismatch (small)"

    out_bf16 = jax.block_until_ready(softmax_attention_rbf(Q, K, V, mask))
    assert jnp.allclose(out_bf16, ref, atol=5e-2, rtol=5e-2), "bf16 path mismatch (small)"

    # --- config 2: exercises the q/kv tiling and the KV-axis accumulator ---
    Q2, K2, V2, mask2 = make_inputs(k2, 1, 2, 256, 32)
    ref2 = _reference(Q2, K2, V2, mask2)

    out2_f32 = jax.block_until_ready(
        softmax_attention_rbf(Q2, K2, V2, mask2, block_q=128, block_k=128,
                              compute_dtype=jnp.float32))
    assert jnp.allclose(out2_f32, ref2, atol=5e-4, rtol=5e-4), "f32 path mismatch (tiled)"

    out2_bf16 = jax.block_until_ready(
        softmax_attention_rbf(Q2, K2, V2, mask2, block_q=128, block_k=128))
    assert jnp.allclose(out2_bf16, ref2, atol=5e-2, rtol=5e-2), "bf16 path mismatch (tiled)"

    print("KERNEL_OK")
</pallas_src>

<mosaic_0001>
module attributes {stable_mosaic.version = 11 : i64} {
  func.func @_rbf_attn_kernel(%arg0: i32, %arg1: i32, %arg2: i32, %arg3: memref<4x1x16xf32, #tpu.memory_space<vmem>>, %arg4: memref<4x16x32xf32, #tpu.memory_space<vmem>>, %arg5: memref<4x16x32xf32, #tpu.memory_space<vmem>>, %arg6: memref<4x16x32xf32, #tpu.memory_space<vmem>>, %arg7: memref<4x16x32xf32, #tpu.memory_space<vmem>>, %arg8: memref<4x16x32xf32, #tpu.memory_space<vmem>>) attributes {dimension_semantics = [#tpu.dimension_semantics<parallel>, #tpu.dimension_semantics<parallel>, #tpu.dimension_semantics<arbitrary>], iteration_bounds = array<i64: 1, 1, 1>, scalar_prefetch = 0 : i64, scratch_operands = 1 : i64, tpu.core_type = #tpu.core_type<tc>, window_params = [{transform_indices = @transform_0, window_bounds = array<i64: 4, 1, 16>}, {transform_indices = @transform_1, window_bounds = array<i64: 4, 16, 32>}, {transform_indices = @transform_2, window_bounds = array<i64: 4, 16, 32>}, {transform_indices = @transform_3, window_bounds = array<i64: 4, 16, 32>}, {transform_indices = @transform_4, window_bounds = array<i64: 4, 16, 32>}]} {
    %c0_i32 = arith.constant 0 : i32
    %0 = arith.cmpi eq, %arg2, %c0_i32 : i32
    %1 = arith.extui %0 : i1 to i32
    %c0_i32_0 = arith.constant 0 : i32
    %2 = arith.cmpi ne, %1, %c0_i32_0 : i32
    scf.if %2 {
      %cst_27 = arith.constant 0.000000e+00 : f32
      %35 = vector.broadcast %cst_27 : f32 to vector<4x16x32xf32>
      %c0_28 = arith.constant 0 : index
      %c0_29 = arith.constant 0 : index
      %c0_30 = arith.constant 0 : index
      %36 = vector.load %arg8[%c0_28, %c0_29, %c0_30] : memref<4x16x32xf32, #tpu.memory_space<vmem>>, vector<4x16x32xf32>
      tpu.vector_store %arg8[%c0_28, %c0_29, %c0_30], %35 {strides = array<i32>} : memref<4x16x32xf32, #tpu.memory_space<vmem>>, vector<4x16x32xf32>,
    } else {
    }
    %c0 = arith.constant 0 : index
    %c0_1 = arith.constant 0 : index
    %c0_2 = arith.constant 0 : index
    %3 = vector.load %arg4[%c0, %c0_1, %c0_2] : memref<4x16x32xf32, #tpu.memory_space<vmem>>, vector<4x16x32xf32>
    %c0_3 = arith.constant 0 : index
    %c0_4 = arith.constant 0 : index
    %c0_5 = arith.constant 0 : index
    %4 = vector.load %arg5[%c0_3, %c0_4, %c0_5] : memref<4x16x32xf32, #tpu.memory_space<vmem>>, vector<4x16x32xf32>
    %c0_6 = arith.constant 0 : index
    %c0_7 = arith.constant 0 : index
    %c0_8 = arith.constant 0 : index
    %5 = vector.load %arg3[%c0_6, %c0_7, %c0_8] : memref<4x1x16xf32, #tpu.memory_space<vmem>>, vector<4x1x16xf32>
    %6 = arith.mulf %3, %3 : vector<4x16x32xf32>
    %cst = arith.constant dense<0.000000e+00> : vector<4x16xf32>
    %7 = vector.multi_reduction <add>, %6, %cst [2] : vector<4x16x32xf32> to vector<4x16xf32>
    %8 = vector.shape_cast %7 : vector<4x16xf32> to vector<4x16x1xf32>
    %cst_9 = arith.constant 5.000000e-01 : f32
    %9 = vector.broadcast %cst_9 : f32 to vector<4x16x1xf32>
    %10 = arith.mulf %9, %8 : vector<4x16x1xf32>
    %11 = arith.mulf %4, %4 : vector<4x16x32xf32>
    %cst_10 = arith.constant dense<0.000000e+00> : vector<4x16xf32>
    %12 = vector.multi_reduction <add>, %11, %cst_10 [2] : vector<4x16x32xf32> to vector<4x16xf32>
    %cst_11 = arith.constant 5.000000e-01 : f32
    %13 = vector.broadcast %cst_11 : f32 to vector<4x16xf32>
    %14 = arith.mulf %13, %12 : vector<4x16xf32>
    %15 = vector.shape_cast %14 : vector<4x16xf32> to vector<4x1x16xf32>
    %cst_12 = arith.constant 1.000000e+00 : f32
    %16 = vector.broadcast %cst_12 : f32 to vector<4x1x16xf32>
    %17 = arith.subf %16, %5 : vector<4x1x16xf32>
    %cst_13 = arith.constant 1.000000e+09 : f32
    %18 = vector.broadcast %cst_13 : f32 to vector<4x1x16xf32>
    %19 = arith.mulf %18, %17 : vector<4x1x16xf32>
    %20 = arith.addf %15, %19 : vector<4x1x16xf32>
    %cst_14 = arith.constant dense<0.000000e+00> : vector<4x16x16xf32>
    %21 = tpu.matmul %3, %4, %cst_14 {dimension_numbers = #tpu.dot_dimension_numbers<[2], [2], [1], [1], [0, 0, 0, 1, 1, 1], [0], [0]>} : vector<4x16x32xf32>, vector<4x16x32xf32>, vector<4x16x16xf32> -> vector<4x16x16xf32>
    %22 = vector.broadcast %10 : vector<4x16x1xf32> to vector<4x16x16xf32>
    %23 = arith.subf %21, %22 : vector<4x16x16xf32>
    %24 = vector.broadcast %20 : vector<4x1x16xf32> to vector<4x16x16xf32>
    %25 = arith.subf %23, %24 : vector<4x16x16xf32>
    %26 = math.exp %25 : vector<4x16x16xf32>
    %c0_15 = arith.constant 0 : index
    %c0_16 = arith.constant 0 : index
    %c0_17 = arith.constant 0 : index
    %27 = vector.load %arg8[%c0_15, %c0_16, %c0_17] : memref<4x16x32xf32, #tpu.memory_space<vmem>>, vector<4x16x32xf32>
    %c0_18 = arith.constant 0 : index
    %c0_19 = arith.constant 0 : index
    %c0_20 = arith.constant 0 : index
    %28 = vector.load %arg6[%c0_18, %c0_19, %c0_20] : memref<4x16x32xf32, #tpu.memory_space<vmem>>, vector<4x16x32xf32>
    %cst_21 = arith.constant dense<0.000000e+00> : vector<4x16x32xf32>
    %29 = tpu.matmul %26, %28, %cst_21 {dimension_numbers = #tpu.dot_dimension_numbers<[2], [1], [1], [2], [0, 0, 0, 1, 1, 2], [0], [0]>} : vector<4x16x16xf32>, vector<4x16x32xf32>, vector<4x16x32xf32> -> vector<4x16x32xf32>
    %30 = arith.addf %27, %29 : vector<4x16x32xf32>
    %c0_22 = arith.constant 0 : index
    %c0_23 = arith.constant 0 : index
    %c0_24 = arith.constant 0 : index
    %31 = vector.load %arg8[%c0_22, %c0_23, %c0_24] : memref<4x16x32xf32, #tpu.memory_space<vmem>>, vector<4x16x32xf32>
    tpu.vector_store %arg8[%c0_22, %c0_23, %c0_24], %30 {strides = array<i32>} : memref<4x16x32xf32, #tpu.memory_space<vmem>>, vector<4x16x32xf32>,
    %c0_i32_25 = arith.constant 0 : i32
    %32 = arith.cmpi eq, %arg2, %c0_i32_25 : i32
    %33 = arith.extui %32 : i1 to i32
    %c0_i32_26 = arith.constant 0 : i32
    %34 = arith.cmpi ne, %33, %c0_i32_26 : i32
    scf.if %34 {
      %c0_27 = arith.constant 0 : index
      %c0_28 = arith.constant 0 : index
      %c0_29 = arith.constant 0 : index
      %35 = vector.load %arg8[%c0_27, %c0_28, %c0_29] : memref<4x16x32xf32, #tpu.memory_space<vmem>>, vector<4x16x32xf32>
      %c0_30 = arith.constant 0 : index
      %c0_31 = arith.constant 0 : index
      %c0_32 = arith.constant 0 : index
      %36 = vector.load %arg7[%c0_30, %c0_31, %c0_32] : memref<4x16x32xf32, #tpu.memory_space<vmem>>, vector<4x16x32xf32>
      tpu.vector_store %arg7[%c0_30, %c0_31, %c0_32], %35 {strides = array<i32>} : memref<4x16x32xf32, #tpu.memory_space<vmem>>, vector<4x16x32xf32>,
    } else {
    }
    return
  }
  func.func @transform_0(%arg0: i32, %arg1: i32, %arg2: i32) -> (i32, i32, i32) {
    %c0_i32 = arith.constant 0 : i32
    %c0_i32_0 = arith.constant 0 : i32
    return %arg0, %c0_i32, %arg2 : i32, i32, i32
  }
  func.func @transform_1(%arg0: i32, %arg1: i32, %arg2: i32) -> (i32, i32, i32) {
    %c0_i32 = arith.constant 0 : i32
    %c0_i32_0 = arith.constant 0 : i32
    return %arg0, %arg1, %c0_i32 : i32, i32, i32
  }
  func.func @transform_2(%arg0: i32, %arg1: i32, %arg2: i32) -> (i32, i32, i32) {
    %c0_i32 = arith.constant 0 : i32
    %c0_i32_0 = arith.constant 0 : i32
    return %arg0, %arg2, %c0_i32 : i32, i32, i32
  }
  func.func @transform_3(%arg0: i32, %arg1: i32, %arg2: i32) -> (i32, i32, i32) {
    %c0_i32 = arith.constant 0 : i32
    %c0_i32_0 = arith.constant 0 : i32
    return %arg0, %arg2, %c0_i32 : i32, i32, i32
  }
  func.func @transform_4(%arg0: i32, %arg1: i32, %arg2: i32) -> (i32, i32, i32) {
    %c0_i32 = arith.constant 0 : i32
    %c0_i32_0 = arith.constant 0 : i32
    return %arg0, %arg1, %c0_i32 : i32, i32, i32
  }
}

</mosaic_0001>

<bundles_post_ra>
// kernel: tpu_custom_call.1
= control target key start
LH: loop header
LB: loop body
LE: loop exit
PB: predicated region body
PF: predicated region fallthrough
CT: control target
= control target key end

     0   :  { %9 = vsyncpa [#allocation4], 0  ;;  %s1679_s0 = inlined_call_operand.hbm [shape: f32[4,1,16], index: 0, kind: input, shape index: {}]   ;;  %s1680_s1 = inlined_call_operand.hbm [shape: f32[4,16,32], index: 1, kind: input, shape index: {}]   ;;  %s1681_s2 = inlined_call_operand.hbm [shape: f32[4,16,32], index: 2, kind: input, shape index: {}]   ;;  %s1682_s3 = inlined_call_operand.hbm [shape: f32[4,16,32], index: 3, kind: input, shape index: {}]   ;;  %s1683_s4 = inlined_call_operand.hbm [shape: f32[4,16,32], index: 4, kind: output, shape index: {}]  }
   0x1   :  { %10 = vsyncpa [#allocation7], 0 }
   0x2   :  { %11 = vsyncpa [#allocation10], 0 }
   0x3   :  { %12 = vsyncpa [#allocation5], 0  ;;  %s1439_s15 = smov [#allocation6]   ;;  %s1321_s19 = scalar_lea.hbm %s1680_s1, 1024 }
   0x4   :  { %s30_s16 = sshll.u32 %s1439_s15, 4  ;;  %p1322_p0 = scmp.ne.s32.totalorder %s1680_s1, %s1321_s19  ;;  %s31_s16 = int_to_ptr.vmem [resolvable:$true] %s30_s16 }
   0x5   :  { %p1325_p1 = scmp.lt.u32.totalorder %s1321_s19, %s1680_s1 }
   0x7   :  { %p1327_p2 = pnand %p1325_p1, %p1322_p0 }
   0x9   :  { %1330 = shalt.err (!%p1327_p2)
}
   0xa   :  { %s1331_s24 = scalar_lea.vmem %s31_s16, 1024  ;;  %p1336_p4 = scmp.lt.s32.totalorder %s31_s16, %s31_s16 }
   0xb   :  { %p1332_p3 = scmp.ne.s32.totalorder %s31_s16, %s1331_s24  ;;  %p1337_p5 = scmp.lt.s32.totalorder %s1331_s24, %s1331_s24 }
   0xd   :  { %p1338_p6 = por %p1337_p5, %p1336_p4 }
   0xf   :  { %p1339_p7 = pnand %p1338_p6, %p1332_p3 }
  0x11   :  { %1342 = shalt.err (!%p1339_p7)
}
  0x12   :  { %s1440_s25 = smov 128   ;;  %s1441_s26 = smov 8  }
  0x13   :  { %36 = dma.hbm_to_vmem [thread:$0]  %s1680_s1, 1024, %s31_s16, [#allocation7], %s1440_s25, %s1440_s25, %s1441_s26  }
  0x14   :  { %s1442_s29 = smov [#allocation3]   ;;  %s1343_s7 = scalar_lea.hbm %s1679_s0, 64 }
  0x15   :  { %s18_s30 = sshll.u32 %s1442_s29, 4  ;;  %p1344_p8 = scmp.ne.s32.totalorder %s1679_s0, %s1343_s7  ;;  %s19_s30 = int_to_ptr.vmem [resolvable:$true] %s18_s30 }
  0x16   :  { %p1347_p9 = scmp.lt.u32.totalorder %s1343_s7, %s1679_s0 }
  0x18   :  { %p1349_p10 = pnand %p1347_p9, %p1344_p8 }
  0x1a   :  { %1352 = shalt.err (!%p1349_p10)
}
  0x1b   :  { %s1353_s12 = scalar_lea.vmem %s19_s30, 64  ;;  %p1358_p12 = scmp.lt.s32.totalorder %s19_s30, %s19_s30 }
  0x1c   :  { %p1354_p11 = scmp.ne.s32.totalorder %s19_s30, %s1353_s12  ;;  %p1359_p13 = scmp.lt.s32.totalorder %s1353_s12, %s1353_s12 }
  0x1e   :  { %p1360_p0 = por %p1359_p13, %p1358_p12 }
  0x20   :  { %p1361_p1 = pnand %p1360_p0, %p1354_p11 }
  0x22   :  { %1364 = shalt.err (!%p1361_p1)
}
  0x23   :  { %s1443_s1 = smov 16   ;;  %s1444_s13 = smov 1  }
  0x24   :  { %24 = dma.hbm_to_vmem [thread:$0]  %s1679_s0, 64, %s19_s30, [#allocation4], %s1443_s1, %s1443_s1, %s1444_s13  }
  0x25   :  { %s1445_s16 = smov [#allocation8]   ;;  %s1446_s18 = smov [#allocation9]  }
  0x26   :  { %s42_s17 = sshll.u32 %s1445_s16, 4  ;;  %s54_s19 = sshll.u32 %s1446_s18, 4  ;;  %s43_s17 = int_to_ptr.vmem [resolvable:$true] %s42_s17  ;;  %s1502_s19 = int_to_ptr.vmem [resolvable:$true] %s54_s19 }
  0x27   :  { %s1365_s22 = scalar_lea.hbm %s1681_s2, 1024 }
  0x28   :  { %p1366_p2 = scmp.ne.s32.totalorder %s1681_s2, %s1365_s22  ;;  %p1369_p3 = scmp.lt.u32.totalorder %s1365_s22, %s1681_s2 }
  0x2a   :  { %p1371_p4 = pnand %p1369_p3, %p1366_p2 }
  0x2c   :  { %1374 = shalt.err (!%p1371_p4)
}
  0x2d   :  { %s1375_s0 = scalar_lea.vmem %s43_s17, 1024  ;;  %p1380_p6 = scmp.lt.s32.totalorder %s43_s17, %s43_s17 }
  0x2e   :  { %p1376_p5 = scmp.ne.s32.totalorder %s43_s17, %s1375_s0  ;;  %p1381_p7 = scmp.lt.s32.totalorder %s1375_s0, %s1375_s0 }
  0x30   :  { %p1382_p8 = por %p1381_p7, %p1380_p6 }
  0x32   :  { %p1383_p9 = pnand %p1382_p8, %p1376_p5 }
  0x34   :  { %1386 = shalt.err (!%p1383_p9)
}
  0x35   :  { %48 = dma.hbm_to_vmem [thread:$0]  %s1681_s2, 1024, %s43_s17, [#allocation7], %s1440_s25, %s1440_s25, %s1441_s26  }
  0x36   :  { %s1387_s7 = scalar_lea.hbm %s1682_s3, 1024 }
  0x37   :  { %p1388_p10 = scmp.ne.s32.totalorder %s1682_s3, %s1387_s7  ;;  %p1391_p11 = scmp.lt.u32.totalorder %s1387_s7, %s1682_s3 }
  0x39   :  { %p1393_p12 = pnand %p1391_p11, %p1388_p10 }
  0x3b   :  { %1396 = shalt.err (!%p1393_p12)
}
  0x3c   :  { %s1397_s12 = scalar_lea.vmem %s1502_s19, 1024  ;;  %p1402_p0 = scmp.lt.s32.totalorder %s1502_s19, %s1502_s19 }
  0x3d   :  { %p1398_p13 = scmp.ne.s32.totalorder %s1502_s19, %s1397_s12  ;;  %p1403_p1 = scmp.lt.s32.totalorder %s1397_s12, %s1397_s12 }
  0x3f   :  { %p1404_p2 = por %p1403_p1, %p1402_p0 }
  0x41   :  { %p1405_p3 = pnand %p1404_p2, %p1398_p13 }
  0x43   :  { %1408 = shalt.err (!%p1405_p3)
}
  0x44   :  { %60 = dma.hbm_to_vmem [thread:$0]  %s1682_s3, 1024, %s1502_s19, [#allocation10], %s1440_s25, %s1440_s25, %s1441_s26  }
  0x45   :  { %1431 = dma.done.wait [#allocation4], 64  }
  0x46   :  { %1432 = vsyncadd [#allocation4], 4294967232 }
  0x47   :  { %1433 = dma.done.wait [#allocation7], 2048  }
  0x48   :  { %1434 = vsyncadd [#allocation7], 4294965248 }
  0x49   :  { %1435 = dma.done.wait [#allocation10], 1024  }
  0x4a   :  { %1436 = vsyncadd [#allocation10], 4294966272  ;;  %vm77_vm0 = vcmask 261120   ;;  %v96_v1 = vld [vmem:[#allocation8 + $0x10] sm:$0xff]  ;;  %v94_v2 = vld [vmem:[#allocation8] sm:$0xff]  ;;  %v199_v35 = vlaneseq  ;;  %v1447_v53 = vmov 0  }
  0x4b   :  { %vm1541_vm1 = vmpackc.low %vm77_vm0, %vm77_vm0  ;;  %v97_v3 = vld [vmem:[#allocation8 + $0x18] sm:$0xff]  ;;  %v149_v4 = vmul.f32 %v96_v1, %v96_v1  ;;  %v147_v5 = vmul.f32 %v94_v2, %v94_v2  ;;  %v95_v7 = vld [vmem:[#allocation8 + $0x8] sm:$0xff]  ;;  %1304 = vset.pattern.permute.xlu1 %v1447_v53  ;;  %1303 = vset.pattern.permute.xlu0 %v1447_v53  ;;  %vm658_vm2 = vcmask 130112   ;;  %vm761_vm3 = vcmask 130048   ;;  %s1449_s3 = smov [#allocation11]  }
  0x4c   :  { %v150_v6 = vmul.f32 %v97_v3, %v97_v3  ;;  %v99_v8 = vld [vmem:[#allocation8 + $0x28] sm:$0xff]  ;;  %v1258_v9 = vpack.c.bf16 %v97_v3, %v96_v1  ;;  %v148_v10 = vmul.f32 %v95_v7, %v95_v7  ;;  %v98_v11 = vld [vmem:[#allocation8 + $0x20] sm:$0xff]  ;;  %v1549_v14 = vld [vmem:[#allocation6 + $0x10] sm:$0xff]  ;;  %v1252_v24 = vpack.c.bf16 %v95_v7, %v94_v2  ;;  %s1126_s13 = sshll.u32 %s1449_s3, 4  ;;  %s1127_s13 = int_to_ptr.vmem [resolvable:$true] %s1126_s13 }
  0x4d   :  { %v161_v12 = vsel %vm77_vm0, %v149_v4, 0.0  ;;  %v155_v13 = vsel %vm77_vm0, %v147_v5, 0.0  ;;  %v152_v15 = vmul.f32 %v99_v8, %v99_v8  ;;  %v101_v16 = vld [vmem:[#allocation8 + $0x38] sm:$0xff]  ;;  %v100_v17 = vld [vmem:[#allocation8 + $0x30] sm:$0xff]  ;;  %v151_v20 = vmul.f32 %v98_v11, %v98_v11  ;;  %1207 = vmatprep.mubr.msk.f32.mxu1 %vm77_vm0, %v1549_v14  ;;  %v1557_v22 = vld [vmem:[#allocation6] sm:$0xff]  ;;  %s1409_s14 = scalar_lea.vmem %s1127_s13, 1024  ;;  %p1414_p5 = scmp.lt.s32.totalorder %s1127_s13, %s1127_s13 }
  0x4e   :  { %1260 = vmatprep.subr.msk.bf16.mxu1 %vm1541_vm1, %v1258_v9  ;;  %162 = vadd.xlane.f32.xlu1 %v161_v12  ;;  %v164_v18 = vsel %vm77_vm0, %v150_v6, 0.0  ;;  %v158_v19 = vsel %vm77_vm0, %v148_v10, 0.0  ;;  %v1270_v21 = vpack.c.bf16 %v101_v16, %v100_v17  ;;  %v1264_v23 = vpack.c.bf16 %v99_v8, %v98_v11  ;;  %v89_v29 = vld [vmem:[#allocation6 + $0x18] sm:$0xff]  ;;  %v92_v30 = vld [vmem:[#allocation6 + $0x30] sm:$0xff]  ;;  %v87_v33 = vld [vmem:[#allocation6 + $0x8] sm:$0xff]  ;;  %p1410_p4 = scmp.ne.s32.totalorder %s1127_s13, %s1409_s14  ;;  %p1415_p6 = scmp.lt.s32.totalorder %s1409_s14, %s1409_s14 }
  0x4f   :  { %156 = vadd.xlane.f32.xlu0 %v155_v13  ;;  %1263 = vmatpush3.bf16.xpose.msk.msra.mxu1 %vm1541_vm1, %v1258_v9  ;;  %v170_v25 = vsel %vm77_vm0, %v152_v15, 0.0  ;;  %v167_v26 = vsel %vm77_vm0, %v151_v20, 0.0  ;;  %v154_v27 = vmul.f32 %v101_v16, %v101_v16  ;;  %v153_v28 = vmul.f32 %v100_v17, %v100_v17  ;;  %v90_v34 = vld [vmem:[#allocation6 + $0x20] sm:$0xff]  ;;  %v102_v36 = vld [vmem:[#allocation3] sm:$0x1]  ;;  %v91_v41 = vld [vmem:[#allocation6 + $0x28] sm:$0xff] }
  0x50   :  { %1272 = vmatprep.subr.msk.bf16.mxu1 %vm1541_vm1, %v1270_v21  ;;  %1200 = vmatprep.mubr.msk.f32.mxu0 %vm77_vm0, %v1557_v22  ;;  %v93_v37 = vld [vmem:[#allocation6 + $0x38] sm:$0xff]  ;;  %v187_v38 = vsub.f32 1.0, %v102_v36  ;;  %v1582_v39 = vshrl.u32 %v199_v35, 7  ;;  %v106_v57 = vmul.f32 %v1557_v22, %v1557_v22  ;;  %v107_v59 = vmul.f32 %v87_v33, %v87_v33  ;;  %v754_v36 = vld [vmem:[#allocation9 + $0x8] sm:$0xff]  ;;  %p1416_p7 = por %p1415_p6, %p1414_p5 }
  0x51   :  { %1254 = vmatprep.subr.msk.bf16.mxu0 %vm1541_vm1, %v1252_v24  ;;  %v176_v31 = vsel %vm77_vm0, %v154_v27, 0.0  ;;  %v173_v32 = vsel %vm77_vm0, %v153_v28, 0.0  ;;  %v103_v40 = vld [vmem:[#allocation3 + $0x1] sm:$0x1]  ;;  %v104_v45 = vld [vmem:[#allocation3 + $0x2] sm:$0x1]  ;;  %v108_v60 = vmul.f32 %v1549_v14, %v1549_v14  ;;  %v109_v62 = vmul.f32 %v89_v29, %v89_v29 }
  0x52   :  { %165 = vadd.xlane.f32.xlu1 %v164_v18  ;;  %1257 = vmatpush3.bf16.xpose.msk.msra.mxu0 %vm1541_vm1, %v1252_v24  ;;  %v191_v42 = vmul.f32 1e+09, %v187_v38  ;;  %v201_v43 = vsub.s32 0, %v1582_v39  ;;  %v188_v44 = vsub.f32 1.0, %v103_v40  ;;  %v189_v48 = vsub.f32 1.0, %v104_v45  ;;  %v755_v45 = vld [vmem:[#allocation9 + $0x10] sm:$0xff]  ;;  %p1417_p8 = pnand %p1416_p7, %p1410_p4 }
  0x53   :  { %159 = vadd.xlane.f32.xlu0 %v158_v19  ;;  %1266 = vmatprep.subr.msk.bf16.mxu0 %vm1541_vm1, %v1264_v23  ;;  %v105_v49 = vld [vmem:[#allocation3 + $0x3] sm:$0x1]  ;;  %v115_v58 = vsel %vm77_vm0, %v106_v57, 0.0  ;;  %v118_v61 = vsel %vm77_vm0, %v107_v59, 0.0  ;;  %v124_v63 = vsel %vm77_vm0, %v109_v62, 0.0  ;;  %v121_v0 = vsel %vm77_vm0, %v108_v60, 0.0 }
  0x54   :  { %v202_v46 = vrot.slane %v191_v42, %v201_v43  ;;  %v192_v47 = vmul.f32 1e+09, %v188_v44  ;;  %v193_v51 = vmul.f32 1e+09, %v189_v48  ;;  %v190_v52 = vsub.f32 1.0, %v105_v49  ;;  %v757_v49 = vld [vmem:[#allocation9 + $0x20] sm:$0xff] }
  0x55   :  { %v110_v1 = vmul.f32 %v90_v34, %v90_v34  ;;  %v112_v2 = vmul.f32 %v92_v30, %v92_v30  ;;  %v111_v5 = vmul.f32 %v91_v41, %v91_v41  ;;  %v113_v6 = vmul.f32 %v93_v37, %v93_v37  ;;  %v760_v53 = vld [vmem:[#allocation9 + $0x38] sm:$0xff] }
  0x56   :  { %171 = vadd.xlane.f32.xlu1 %v170_v25  ;;  %1208 = vmatmul.mubr.msk.f32.vlgmr.msra.gmra.mrb[0].mxu1 %vm77_vm0, %v89_v29  ;;  %v206_v50 = vrot.slane %v192_v47, %v201_v43  ;;  %v210_v54 = vrot.slane %v193_v51, %v201_v43  ;;  %v194_v55 = vmul.f32 1e+09, %v190_v52  ;;  %v759_v52 = vld [vmem:[#allocation9 + $0x30] sm:$0xff] }
  0x57   :  { %168 = vadd.xlane.f32.xlu0 %v167_v26  ;;  %1275 = vmatpush3.bf16.xpose.msk.msra.mxu1 %vm1541_vm1, %v1270_v21  ;;  %v127_v3 = vsel %vm77_vm0, %v110_v1, 0.0  ;;  %v133_v4 = vsel %vm77_vm0, %v112_v2, 0.0  ;;  %v130_v7 = vsel %vm77_vm0, %v111_v5, 0.0  ;;  %v136_v8 = vsel %vm77_vm0, %v113_v6, 0.0 }
  0x58   :  { %1221 = vmatprep.mubr.msk.f32.mxu1 %vm77_vm0, %v92_v30  ;;  %v214_v56 = vrot.slane %v194_v55, %v201_v43  ;;  %v1448_v55 = vmov 0.0   ;;  %v648_v6 = vand.u32 127, %v199_v35 }
  0x59   :  { %1201 = vmatmul.mubr.msk.f32.vlgmr.msra.gmra.mrb[0].mxu0 %vm77_vm0, %v87_v33  ;;  %79 = vst.msk [vmem:[#allocation2 + $0x8] sm:$0xff] %vm77_vm0, %v1448_v55  ;;  %78 = vst.msk [vmem:[#allocation2] sm:$0xff] %vm77_vm0, %v1448_v55 }
  0x5a   :  { %177 = vadd.xlane.f32.xlu1 %v176_v31  ;;  %1269 = vmatpush3.bf16.xpose.msk.msra.mxu0 %vm1541_vm1, %v1264_v23  ;;  %80 = vst.msk [vmem:[#allocation2 + $0x10] sm:$0xff] %vm77_vm0, %v1448_v55  ;;  %81 = vst.msk [vmem:[#allocation2 + $0x18] sm:$0xff] %vm77_vm0, %v1448_v55 }
  0x5b   :  { %174 = vadd.xlane.f32.xlu0 %v173_v32  ;;  %1214 = vmatprep.mubr.msk.f32.mxu0 %vm77_vm0, %v90_v34  ;;  %v753_v34 = vld [vmem:[#allocation9] sm:$0xff]  ;;  %82 = vst.msk [vmem:[#allocation2 + $0x20] sm:$0xff] %vm77_vm0, %v1448_v55  ;;  %83 = vst.msk [vmem:[#allocation2 + $0x28] sm:$0xff] %vm77_vm0, %v1448_v55 }
  0x5c   :  { %v1276_v38 = vpack.c.bf16 %v754_v36, %v753_v34  ;;  %84 = vst.msk [vmem:[#allocation2 + $0x30] sm:$0xff] %vm77_vm0, %v1448_v55  ;;  %85 = vst.msk [vmem:[#allocation2 + $0x38] sm:$0xff] %vm77_vm0, %v1448_v55 }
  0x5e   :  { %1222 = vmatmul.mubr.msk.f32.vlgmr.msra.gmra.mrb[2].mxu1 %vm77_vm0, %v93_v37  ;;  %1277 = vmatprep.subr.bf16.mxu0 %v1276_v38 }
  0x61   :  { %1215 = vmatmul.mubr.msk.f32.vlgmr.msra.gmra.mrb[2].mxu0 %vm77_vm0, %v91_v41 }
  0x62   :  { %1279 = vmatpush3.bf16.msra.mxu0 %v1276_v38 }
  0x6b   :  { %220 = vbcast.lane.b32.xlu1 %v202_v46, 264 }
  0x6f   :  { %223 = vbcast.lane.b32.xlu1 %v206_v50, 256 }
  0x71   :  { %216 = vbcast.lane.b32.xlu0 %v202_v46, 256  ;;  %v756_v46 = vld [vmem:[#allocation9 + $0x18] sm:$0xff] }
  0x72   :  { %v1280_v48 = vpack.c.bf16 %v756_v46, %v755_v45 }
  0x73   :  { %227 = vbcast.lane.b32.xlu1 %v206_v50, 264  ;;  %v758_v50 = vld [vmem:[#allocation9 + $0x28] sm:$0xff] }
  0x74   :  { %1281 = vmatprep.subr.bf16.mxu1 %v1280_v48  ;;  %v1599_v51 = vpack.c.bf16 %v758_v50, %v757_v49 }
  0x75   :  { %230 = vbcast.lane.b32.xlu0 %v210_v54, 256  ;;  %1283 = vmatpush3.bf16.msra.mxu1 %v1280_v48 }
  0x76   :  { %1285 = vmatprep.subr.bf16.mxu0 %v1599_v51 }
  0x77   :  { %234 = vbcast.lane.b32.xlu1 %v210_v54, 264  ;;  %v1602_v54 = vpack.c.bf16 %v760_v53, %v759_v52 }
  0x79   :  { %237 = vbcast.lane.b32.xlu0 %v214_v56, 256  ;;  %1289 = vmatprep.subr.bf16.mxu1 %v1602_v54 }
  0x7b   :  { %241 = vbcast.lane.b32.xlu1 %v214_v56, 264 }
  0x98   :  { %116 = vadd.xlane.f32.xlu0 %v115_v58 }
  0x9c   :  { %119 = vadd.xlane.f32.xlu0 %v118_v61 }
  0x9f   :  { %122 = vadd.xlane.f32.xlu1 %v121_v0 }
  0xa0   :  { %125 = vadd.xlane.f32.xlu0 %v124_v63 }
  0xa3   :  { %134 = vadd.xlane.f32.xlu1 %v133_v4 }
  0xa4   :  { %128 = vadd.xlane.f32.xlu0 %v127_v3 }
  0xa7   :  { %137 = vadd.xlane.f32.xlu1 %v136_v8 }
  0xa8   :  { %131 = vadd.xlane.f32.xlu0 %v130_v7  ;;  %v653_v7 = vadd.s32 4294967288, %v648_v6 }
  0xdb   :  { %v163_v9 = vpop.xlane.xlu1 %162 }
  0xdc   :  { %v157_v10 = vpop.xlane.xlu0 %156  ;;  %v181_v23 = vmul.f32 0.5, %v163_v9 }
  0xdd   :  { %v179_v17 = vmul.f32 0.5, %v157_v10 }
  0xdf   :  { %v166_v11 = vpop.xlane.xlu1 %165 }
  0xe0   :  { %v160_v12 = vpop.xlane.xlu0 %159  ;;  %v182_v26 = vmul.f32 0.5, %v166_v11  ;;  %v1619_v11 = vsub.s32 %v653_v7, %v1582_v39 }
  0xe1   :  { %v180_v18 = vmul.f32 0.5, %v160_v12  ;;  %v1622_v12 = vsub.s32 %v648_v6, %v1582_v39 }
  0xe3   :  { %v172_v13 = vpop.xlane.xlu1 %171 }
  0xe4   :  { %v169_v14 = vpop.xlane.xlu0 %168  ;;  %v184_v33 = vmul.f32 0.5, %v172_v13 }
  0xe5   :  { %v183_v30 = vmul.f32 0.5, %v169_v14 }
  0xe7   :  { %v178_v15 = vpop.xlane.xlu1 %177 }
  0xe8   :  { %v175_v16 = vpop.xlane.xlu0 %174  ;;  %v186_v44 = vmul.f32 0.5, %v178_v15 }
  0xe9   :  { %v185_v41 = vmul.f32 0.5, %v175_v16 }
  0xeb   :  { %v221_v19 = vpop.permute.xlu1 %220 }
  0xec   :  { %v217_v20 = vpop.permute.xlu0 %216  ;;  %v252_v21 = vadd.f32 %v221_v19, %v180_v18 }
  0xed   :  { %v251_v22 = vadd.f32 %v217_v20, %v179_v17 }
  0xee   :  { %627 = vperm.xlu1 %1304, %v252_v21  }
  0xef   :  { %624 = vperm.xlu0 %1303, %v251_v22   ;;  %v224_v24 = vpop.permute.xlu1 %223 }
  0xf0   :  { %v253_v25 = vadd.f32 %v224_v24, %v181_v23  ;;  %v231_v29 = vpop.permute.xlu0 %230 }
  0xf1   :  { %v255_v31 = vadd.f32 %v231_v29, %v183_v30 }
  0xf2   :  { %630 = vperm.xlu1 %1304, %v253_v25  }
  0xf3   :  { %v228_v27 = vpop.permute.xlu1 %227 }
  0xf4   :  { %v254_v28 = vadd.f32 %v228_v27, %v182_v26  ;;  %v238_v40 = vpop.permute.xlu0 %237 }
  0xf5   :  { %v257_v42 = vadd.f32 %v238_v40, %v185_v41 }
  0xf6   :  { %633 = vperm.xlu1 %1304, %v254_v28  }
  0xf7   :  { %v235_v32 = vpop.permute.xlu1 %234 }
  0xf8   :  { %v256_v37 = vadd.f32 %v235_v32, %v184_v33 }
  0xfa   :  { %636 = vperm.xlu1 %1304, %v255_v31  }
  0xfb   :  { %v242_v43 = vpop.permute.xlu1 %241 }
  0xfc   :  { %v258_v47 = vadd.f32 %v242_v43, %v186_v44 }
  0xfe   :  { %639 = vperm.xlu1 %1304, %v256_v37  }
 0x102   :  { %642 = vperm.xlu1 %1304, %v257_v42  }
 0x106   :  { %645 = vperm.xlu1 %1304, %v258_v47  }
 0x125   :  { %v117_v0 = vpop.xlane.xlu0 %116 }
 0x126   :  { %v139_v13 = vmul.f32 0.5, %v117_v0 }
 0x129   :  { %v1209_v56 = vpop.f32.mrb[0].mxu1  ;;  %v120_v1 = vpop.xlane.xlu0 %119 }
 0x12a   :  { %v424_v57 = vpop.f32.mrb[1].mxu1  ;;  %v140_v10 = vmul.f32 0.5, %v120_v1 }
 0x12c   :  { %v1202_v58 = vpop.f32.mrb[0].mxu0  ;;  %v123_v2 = vpop.xlane.xlu1 %122 }
 0x12d   :  { %v337_v59 = vpop.f32.mrb[1].mxu0  ;;  %v126_v3 = vpop.xlane.xlu0 %125  ;;  %v608_v14 = vsub.f32 %v1202_v58, %v140_v10  ;;  %v141_v23 = vmul.f32 0.5, %v123_v2  ;;  %v745_v10 = vld [vmem:[#allocation2] sm:$0xff] }
 0x12e   :  { %v607_v35 = vsub.f32 %v337_v59, %v139_v13  ;;  %v142_v24 = vmul.f32 0.5, %v126_v3 }
 0x12f   :  { %v609_v30 = vsub.f32 %v424_v57, %v141_v23 }
 0x130   :  { %v135_v4 = vpop.xlane.xlu1 %134  ;;  %v610_v29 = vsub.f32 %v1209_v56, %v142_v24 }
 0x131   :  { %v1613_v60 = vpop.f32.mrb[2].mxu1  ;;  %v129_v5 = vpop.xlane.xlu0 %128  ;;  %v145_v53 = vmul.f32 0.5, %v135_v4 }
 0x132   :  { %v1615_v61 = vpop.f32.mrb[3].mxu1  ;;  %v143_v36 = vmul.f32 0.5, %v129_v5 }
 0x133   :  { %v613_v0 = vsub.f32 %v1615_v61, %v145_v53 }
 0x134   :  { %v1216_v62 = vpop.f32.mrb[2].mxu0  ;;  %v138_v8 = vpop.xlane.xlu1 %137 }
 0x135   :  { %v511_v63 = vpop.f32.mrb[3].mxu0  ;;  %v132_v9 = vpop.xlane.xlu0 %131  ;;  %v146_v55 = vmul.f32 0.5, %v138_v8 }
 0x136   :  { %v144_v37 = vmul.f32 0.5, %v132_v9  ;;  %v611_v46 = vsub.f32 %v511_v63, %v143_v36  ;;  %v746_v9 = vld [vmem:[#allocation2 + $0x8] sm:$0xff] }
 0x137   :  { %v614_v1 = vsub.f32 %v1613_v60, %v146_v55 }
 0x138   :  { %v612_v45 = vsub.f32 %v1216_v62, %v144_v37 }
 0x16d   :  { %v628_v15 = vpop.permute.xlu1 %627 }
 0x16e   :  { %v625_v16 = vpop.permute.xlu0 %624  ;;  %v657_v17 = vrot.slane %v628_v15, %v1619_v11  ;;  %v747_v15 = vld [vmem:[#allocation2 + $0x10] sm:$0xff] }
 0x16f   :  { %v652_v18 = vrot.slane %v625_v16, %v1622_v12 }
 0x171   :  { %v659_v19 = vsel %vm658_vm2, %v657_v17, %v652_v18  ;;  %v631_v22 = vpop.permute.xlu1 %630 }
 0x172   :  { %v721_v20 = vsub.f32 %v607_v35, %v659_v19  ;;  %v722_v21 = vsub.f32 %v608_v14, %v659_v19  ;;  %v663_v27 = vrot.slane %v631_v22, %v1622_v12  ;;  %v748_v14 = vld [vmem:[#allocation2 + $0x18] sm:$0xff]  ;;  %v749_v22 = vld [vmem:[#allocation2 + $0x20] sm:$0xff] }
 0x174   :  { %v729_v25 = vmul.f32 1.442695, %v721_v20  ;;  %v731_v39 = vmul.f32 1.442695, %v722_v21  ;;  %v750_v21 = vld [vmem:[#allocation2 + $0x28] sm:$0xff] }
 0x175   :  { %v634_v26 = vpop.permute.xlu1 %633 }
 0x176   :  { %1305 = vpow2.f32 %v729_v25  ;;  %v667_v28 = vrot.slane %v634_v26, %v1619_v11 }
 0x177   :  { %1307 = vpow2.f32 %v731_v39 }
 0x178   :  { %v668_v31 = vsel %vm658_vm2, %v667_v28, %v663_v27  ;;  %v752_v28 = vld [vmem:[#allocation2 + $0x38] sm:$0xff] }
 0x179   :  { %v723_v32 = vsub.f32 %v609_v30, %v668_v31  ;;  %v724_v33 = vsub.f32 %v610_v29, %v668_v31  ;;  %v637_v34 = vpop.permute.xlu1 %636  ;;  %v751_v29 = vld [vmem:[#allocation2 + $0x30] sm:$0xff] }
 0x17a   :  { %v672_v42 = vrot.slane %v637_v34, %v1622_v12 }
 0x17b   :  { %v733_v38 = vmul.f32 1.442695, %v723_v32  ;;  %v735_v40 = vmul.f32 1.442695, %v724_v33 }
 0x17d   :  { %1309 = vpow2.f32 %v733_v38  ;;  %v640_v41 = vpop.permute.xlu1 %639 }
 0x17e   :  { %1311 = vpow2.f32 %v735_v40  ;;  %v676_v43 = vrot.slane %v640_v41, %v1619_v11 }
 0x180   :  { %v1306_v44 = vpop.eup %1305  ;;  %v677_v48 = vsel %vm658_vm2, %v676_v43, %v672_v42 }
 0x181   :  { %v1308_v47 = vpop.eup %1307  ;;  %1228 = vmatprep.mubr.msk.f32.mxu0 %vm761_vm3, %v1306_v44  ;;  %v725_v49 = vsub.f32 %v611_v46, %v677_v48  ;;  %v726_v50 = vsub.f32 %v612_v45, %v677_v48  ;;  %v643_v52 = vpop.permute.xlu1 %642 }
 0x182   :  { %1229 = vmatmul.mubr.msk.f32.vlgmr.msra.gmra.mrb[4].mxu0 %vm761_vm3, %v1308_v47  ;;  %v681_v59 = vrot.slane %v643_v52, %v1622_v12 }
 0x183   :  { %1287 = vmatpush3.bf16.msra.mxu0 %v1599_v51  ;;  %v737_v56 = vmul.f32 1.442695, %v725_v49  ;;  %v739_v57 = vmul.f32 1.442695, %v726_v50 }
 0x185   :  { %1313 = vpow2.f32 %v737_v56  ;;  %v646_v58 = vpop.permute.xlu1 %645 }
 0x186   :  { %1315 = vpow2.f32 %v739_v57  ;;  %v685_v62 = vrot.slane %v646_v58, %v1619_v11 }
 0x187   :  { %v1310_v63 = vpop.eup %1309 }
 0x188   :  { %v1312_v2 = vpop.eup %1311  ;;  %v686_v3 = vsel %vm658_vm2, %v685_v62, %v681_v59  ;;  %1235 = vmatprep.mubr.msk.f32.mxu1 %vm761_vm3, %v1310_v63 }
 0x189   :  { %v727_v51 = vsub.f32 %v613_v0, %v686_v3  ;;  %v728_v4 = vsub.f32 %v614_v1, %v686_v3  ;;  %1236 = vmatmul.mubr.msk.f32.vlgmr.msra.gmra.mrb[4].mxu1 %vm761_vm3, %v1312_v2 }
 0x18a   :  { %1291 = vmatpush3.bf16.msra.mxu1 %v1602_v54 }
 0x18b   :  { %v741_v5 = vmul.f32 1.442695, %v727_v51  ;;  %v743_v6 = vmul.f32 1.442695, %v728_v4 }
 0x18d   :  { %1317 = vpow2.f32 %v741_v5 }
 0x18e   :  { %1319 = vpow2.f32 %v743_v6 }
 0x18f   :  { %v1314_v7 = vpop.eup %1313 }
 0x190   :  { %v1316_v8 = vpop.eup %1315  ;;  %1242 = vmatprep.mubr.msk.f32.mxu0 %vm761_vm3, %v1314_v7 }
 0x191   :  { %1243 = vmatmul.mubr.msk.f32.vlgmr.msra.gmra.mrb[6].mxu0 %vm761_vm3, %v1316_v8 }
 0x197   :  { %v1318_v60 = vpop.eup %1317 }
 0x198   :  { %v1320_v61 = vpop.eup %1319  ;;  %1249 = vmatprep.mubr.msk.f32.mxu1 %vm761_vm3, %v1318_v60 }
 0x199   :  { %1250 = vmatmul.mubr.msk.f32.vlgmr.msra.gmra.mrb[6].mxu1 %vm761_vm3, %v1320_v61 }
 0x255   :  { %v1230_v11 = vpop.f32.mrb[4].mxu0 }
 0x256   :  { %v1087_v54 = vadd.f32 %v1230_v11, %v746_v9  ;;  %v834_v12 = vpop.f32.mrb[5].mxu0 }
 0x257   :  { %v1086_v13 = vadd.f32 %v834_v12, %v745_v10 }
 0x258   :  { %1095 = vst.msk [vmem:[#allocation2 + $0x8] sm:$0xff] %vm77_vm0, %v1087_v54 }
 0x259   :  { %1094 = vst.msk [vmem:[#allocation2] sm:$0xff] %vm77_vm0, %v1086_v13 }
 0x25c   :  { %v1237_v16 = vpop.f32.mrb[4].mxu1 }
 0x25d   :  { %v1089_v17 = vadd.f32 %v1237_v16, %v748_v14  ;;  %v915_v18 = vpop.f32.mrb[5].mxu1 }
 0x25e   :  { %v1088_v35 = vadd.f32 %v915_v18, %v747_v15 }
 0x25f   :  { %v1106_v19 = vld [vmem:[#allocation2 + $0x8] sm:$0xff]  ;;  %1097 = vst.msk [vmem:[#allocation2 + $0x18] sm:$0xff] %vm77_vm0, %v1089_v17 }
 0x260   :  { %v1105_v20 = vld [vmem:[#allocation2] sm:$0xff]  ;;  %1114 = vst.msk [vmem:[#allocation11 + $0x8] sm:$0xff] %vm77_vm0, %v1106_v19  ;;  %1096 = vst.msk [vmem:[#allocation2 + $0x10] sm:$0xff] %vm77_vm0, %v1088_v35 }
 0x261   :  { %1113 = vst.msk [vmem:[#allocation11] sm:$0xff] %vm77_vm0, %v1105_v20 }
 0x264   :  { %v1244_v23 = vpop.f32.mrb[6].mxu0 }
 0x265   :  { %v1091_v24 = vadd.f32 %v1244_v23, %v750_v21  ;;  %v996_v25 = vpop.f32.mrb[7].mxu0 }
 0x266   :  { %v1090_v39 = vadd.f32 %v996_v25, %v749_v22  ;;  %v1108_v26 = vld [vmem:[#allocation2 + $0x18] sm:$0xff] }
 0x267   :  { %1099 = vst.msk [vmem:[#allocation2 + $0x28] sm:$0xff] %vm77_vm0, %v1091_v24  ;;  %v1107_v27 = vld [vmem:[#allocation2 + $0x10] sm:$0xff]  ;;  %1116 = vst.msk [vmem:[#allocation11 + $0x18] sm:$0xff] %vm77_vm0, %v1108_v26 }
 0x268   :  { %1098 = vst.msk [vmem:[#allocation2 + $0x20] sm:$0xff] %vm77_vm0, %v1090_v39  ;;  %1115 = vst.msk [vmem:[#allocation11 + $0x10] sm:$0xff] %vm77_vm0, %v1107_v27 }
 0x26c   :  { %v1251_v30 = vpop.f32.mrb[6].mxu1 }
 0x26d   :  { %v1093_v31 = vadd.f32 %v1251_v30, %v752_v28  ;;  %v1077_v32 = vpop.f32.mrb[7].mxu1 }
 0x26e   :  { %v1092_v33 = vadd.f32 %v1077_v32, %v751_v29  ;;  %v1110_v34 = vld [vmem:[#allocation2 + $0x28] sm:$0xff] }
 0x26f   :  { %1101 = vst.msk [vmem:[#allocation2 + $0x38] sm:$0xff] %vm77_vm0, %v1093_v31  ;;  %v1109_v36 = vld [vmem:[#allocation2 + $0x20] sm:$0xff]  ;;  %1118 = vst.msk [vmem:[#allocation11 + $0x28] sm:$0xff] %vm77_vm0, %v1110_v34 }
 0x270   :  { %1100 = vst.msk [vmem:[#allocation2 + $0x30] sm:$0xff] %vm77_vm0, %v1092_v33  ;;  %1117 = vst.msk [vmem:[#allocation11 + $0x20] sm:$0xff] %vm77_vm0, %v1109_v36 }
 0x276   :  { %v1112_v37 = vld [vmem:[#allocation2 + $0x38] sm:$0xff] }
 0x277   :  { %v1111_v38 = vld [vmem:[#allocation2 + $0x30] sm:$0xff]  ;;  %1120 = vst.msk [vmem:[#allocation11 + $0x38] sm:$0xff] %vm77_vm0, %v1112_v37 }
 0x278   :  { %1119 = vst.msk [vmem:[#allocation11 + $0x30] sm:$0xff] %vm77_vm0, %v1111_v38 }
 0x279   :  { %1420 = shalt.err (!%p1417_p8)
}
 0x27a   :  { %s1421_s17 = scalar_lea.hbm %s1683_s4, 1024 }
 0x27b   :  { %p1422_p9 = scmp.ne.s32.totalorder %s1683_s4, %s1421_s17  ;;  %p1425_p10 = scmp.lt.u32.totalorder %s1421_s17, %s1683_s4 }
 0x27d   :  { %p1427_p11 = pnand %p1425_p10, %p1422_p9 }
 0x27f   :  { %1430 = shalt.err (!%p1427_p11)
}
 0x280   :  { %1132 = dma.vmem_to_hbm [thread:$0]  %s1127_s13, 1024, %s1683_s4, [#allocation5], %s1440_s25, %s1440_s25, %s1441_s26  }
 0x281   :  { %1437 = dma.done.wait [#allocation5], 1024  }
 0x282   :  { %1438 = vsyncadd [#allocation5], 4294966272 }
 0x283   :  { %1136 = vsyncpa [#allocation4], 1 }
 0x284   :  { %1137 = vsyncpa [#allocation7], 1 }
 0x285   :  { %1138 = vsyncpa [#allocation10], 1 }
 0x286   :  { %1139 = vsyncpa [#allocation5], 1 }

</bundles_post_ra>
